<compile_context>
chip_gen: v7x
topology: tpu7x:2x2x1
jax: 0.10.0
libtpu: 0.0.40
codegen_flags: <defaults>
</compile_context>

<pallas_src>
import jax
import jax.numpy as jnp
from jax.experimental import pallas as pl
from jax.experimental.pallas import tpu as pltpu


def _conv_bn_relu_kernel(x_ref, b_ref, scale_ref, shift_ref, out_ref):
    # x_ref:     [M_pad, K_pad]  bf16  fused, row-shifted im2row LHS (zero-padded K)
    # b_ref:     [K_pad, Nc]     bf16  fused banded conv weights (raw, no BN fold)
    # scale_ref: [1, Nc]         f32   per-channel BN scale, tiled over W
    # shift_ref: [1, Nc]         f32   conv bias + BN shift, tiled over W
    # out_ref:   [M_pad, Nc]     f32
    acc = jnp.dot(x_ref[...], b_ref[...], preferred_element_type=jnp.float32)
    out_ref[...] = jnp.maximum(acc * scale_ref[...] + shift_ref[...], 0.0)


def make_basic_conv2d(weight, bias, bn_gamma, bn_beta, bn_mean, bn_var,
                      *, H, W, eps=1e-5):
    """One-time parameter prep + a jitted forward for BasicConv2d (3x3, pad 1)."""
    Cout, Cin, KH, KW = map(int, weight.shape)
    assert (KH, KW) == (3, 3)
    Wp = W + 2                       # padded width
    K = KH * Wp * Cin                # fused contraction depth (216 at toy shape)
    K_pad = max(128, ((K + 127) // 128) * 128)   # 216 -> 256
    Nc = W * Cout                    # lane-dense output width (128 at toy shape)

    # ---- parameter-load-time prep (hoisted out of the per-call jit path) ----
    # Fused banded (Toeplitz) RHS:
    #   B[dh*Wp*Cin + (w+dw)*Cin + cin, w*Cout + cout] = weight[cout, cin, dh, dw]
    w_f32 = weight.astype(jnp.float32)
    wp_idx = jnp.arange(Wp)[:, None, None, None]                  # padded-w index
    wo_idx = jnp.arange(W)[None, None, :, None]                   # output-w index
    bands = []
    for dh in range(KH):
        b4 = jnp.zeros((Wp, Cin, W, Cout), jnp.float32)
        for dw in range(KW):
            mask = (wp_idx == wo_idx + dw).astype(jnp.float32)    # [Wp,1,W,1]
            b4 = b4 + mask * jnp.transpose(w_f32[:, :, dh, dw])[None, :, None, :]
        bands.append(b4.reshape(Wp * Cin, Nc))
    b_mat = jnp.concatenate(bands, axis=0)                        # [K, Nc]
    b_mat = jnp.pad(b_mat, ((0, K_pad - K), (0, 0))).astype(jnp.bfloat16)

    inv_std = 1.0 / jnp.sqrt(bn_var.astype(jnp.float32) + eps)
    scale = bn_gamma.astype(jnp.float32) * inv_std                # [Cout]
    shift = (bias.astype(jnp.float32) - bn_mean.astype(jnp.float32)) * scale \
        + bn_beta.astype(jnp.float32)                             # [Cout]
    scale_row = jnp.tile(scale, W).reshape(1, Nc)                 # [1, Nc] f32
    shift_row = jnp.tile(shift, W).reshape(1, Nc)                 # [1, Nc] f32

    # ---- per-call forward (jitted) ----
    def forward(x_nchw, b_mat, scale_row, shift_row):
        N = x_nchw.shape[0]
        M = N * H
        M_pad = ((M + 7) // 8) * 8

        # NCHW -> NHWC, zero-pad spatially, flatten (W+2, Cin) into lanes.
        x_nhwc = jnp.transpose(x_nchw, (0, 2, 3, 1))              # [N,H,W,Cin]
        xp = jnp.pad(x_nhwc, ((0, 0), (1, 1), (1, 1), (0, 0)))
        xp2d = xp.reshape(N, H + 2, Wp * Cin).astype(jnp.bfloat16)

        # Fused row-shifted LHS: lhs[n*H + h, dh*Wp*Cin + j] = xp2d[n, h+dh, j]
        lhs = jnp.concatenate([xp2d[:, dh:dh + H, :] for dh in range(KH)],
                              axis=-1)                            # [N,H,K]
        lhs = lhs.reshape(M, K)
        lhs = jnp.pad(lhs, ((0, M_pad - M), (0, K_pad - K)))      # [M_pad,K_pad]

        out_flat = pl.pallas_call(
            _conv_bn_relu_kernel,
            out_shape=jax.ShapeDtypeStruct((M_pad, Nc), jnp.float32),
            grid_spec=pltpu.PrefetchScalarGridSpec(
                num_scalar_prefetch=0,
                grid=(1,),                                        # single fused step
                in_specs=[
                    pl.BlockSpec((M_pad, K_pad), lambda i: (0, 0)),
                    pl.BlockSpec((K_pad, Nc), lambda i: (0, 0)),
                    pl.BlockSpec((1, Nc), lambda i: (0, 0)),
                    pl.BlockSpec((1, Nc), lambda i: (0, 0)),
                ],
                out_specs=pl.BlockSpec((M_pad, Nc), lambda i: (0, 0)),
            ),
            compiler_params=pltpu.CompilerParams(
                dimension_semantics=("arbitrary",)),
        )(lhs, b_mat, scale_row, shift_row)

        out = out_flat[:M].reshape(N, H, W, Cout)                 # split lanes
        return jnp.transpose(out, (0, 3, 1, 2))                   # back to NCHW

    return jax.jit(forward), b_mat, scale_row, shift_row


if __name__ == "__main__":
    key = jax.random.PRNGKey(0)
    k_x, k_w, k_b = jax.random.split(key, 3)

    N, Cin, H, W = 2, 4, 16, 16
    Cout, KH, KW = 8, 3, 3

    x = jax.random.normal(k_x, (N, Cin, H, W), dtype=jnp.float32)
    weight = jax.random.normal(k_w, (Cout, Cin, KH, KW), dtype=jnp.float32) * 0.1
    bias = jax.random.normal(k_b, (Cout,), dtype=jnp.float32) * 0.1

    # deterministic (non-trivial) BatchNorm parameters / running stats
    bn_gamma = 1.0 + 0.1 * jnp.arange(Cout, dtype=jnp.float32)
    bn_beta = 0.01 * jnp.arange(Cout, dtype=jnp.float32)
    bn_mean = 0.05 * jnp.arange(Cout, dtype=jnp.float32)
    bn_var = 1.0 + 0.02 * jnp.arange(Cout, dtype=jnp.float32)

    eps = 1e-5
    fwd, b_mat, scale_row, shift_row = make_basic_conv2d(
        weight, bias, bn_gamma, bn_beta, bn_mean, bn_var, H=H, W=W, eps=eps)

    out = fwd(x, b_mat, scale_row, shift_row)
    jax.block_until_ready(out)
    assert out.shape == (N, Cout, H, W)

    scale = bn_gamma / jnp.sqrt(bn_var + eps)
    shift = (bias - bn_mean) * scale + bn_beta

    # (1) Tight check vs. a reference using the same bf16-quantized MXU operands
    #     (validates kernel math; only f32 accumulation-order differences remain).
    xq = x.astype(jnp.bfloat16).astype(jnp.float32)
    wq = weight.astype(jnp.bfloat16).astype(jnp.float32)
    conv_q = jax.lax.conv_general_dilated(
        xq, wq, window_strides=(1, 1), padding=((1, 1), (1, 1)),
        dimension_numbers=("NCHW", "OIHW", "NCHW"),
        precision=jax.lax.Precision.HIGHEST)
    ref_q = jnp.maximum(conv_q * scale[None, :, None, None]
                        + shift[None, :, None, None], 0.0)
    assert jnp.allclose(out, ref_q, atol=1e-4, rtol=1e-4)

    # (2) Semantics check vs. the full-f32 PyTorch-equivalent reference
    #     (looser tolerance because the kernel feeds bf16 operands to the MXU).
    conv = jax.lax.conv_general_dilated(
        x, weight, window_strides=(1, 1), padding=((1, 1), (1, 1)),
        dimension_numbers=("NCHW", "OIHW", "NCHW"),
        precision=jax.lax.Precision.HIGHEST)
    conv = conv + bias[None, :, None, None]
    ref = (conv - bn_mean[None, :, None, None]) * scale[None, :, None, None] \
        + bn_beta[None, :, None, None]
    ref = jnp.maximum(ref, 0.0)
    assert jnp.allclose(out, ref, atol=5e-2, rtol=5e-2)

    print("KERNEL_OK")
</pallas_src>

<mosaic_0001>
module attributes {stable_mosaic.version = 11 : i64} {
  func.func @_conv_bn_relu_kernel(%arg0: i32, %arg1: memref<32x256xbf16, #tpu.memory_space<vmem>>, %arg2: memref<256x128xbf16, #tpu.memory_space<vmem>>, %arg3: memref<1x128xf32, #tpu.memory_space<vmem>>, %arg4: memref<1x128xf32, #tpu.memory_space<vmem>>, %arg5: memref<32x128xf32, #tpu.memory_space<vmem>>) attributes {dimension_semantics = [#tpu.dimension_semantics<arbitrary>], iteration_bounds = array<i64: 1>, scalar_prefetch = 0 : i64, scratch_operands = 0 : i64, tpu.core_type = #tpu.core_type<tc>, window_params = [{pipeline_mode = #tpu.pipeline_mode<synchronous>, transform_indices = @transform_0, window_bounds = array<i64: 32, 256>}, {pipeline_mode = #tpu.pipeline_mode<synchronous>, transform_indices = @transform_1, window_bounds = array<i64: 256, 128>}, {pipeline_mode = #tpu.pipeline_mode<synchronous>, transform_indices = @transform_2, window_bounds = array<i64: 1, 128>}, {pipeline_mode = #tpu.pipeline_mode<synchronous>, transform_indices = @transform_3, window_bounds = array<i64: 1, 128>}, {pipeline_mode = #tpu.pipeline_mode<synchronous>, transform_indices = @transform_4, window_bounds = array<i64: 32, 128>}]} {
    %c0 = arith.constant 0 : index
    %c0_0 = arith.constant 0 : index
    %0 = vector.load %arg1[%c0, %c0_0] : memref<32x256xbf16, #tpu.memory_space<vmem>>, vector<32x256xbf16>
    %c0_1 = arith.constant 0 : index
    %c0_2 = arith.constant 0 : index
    %1 = vector.load %arg2[%c0_1, %c0_2] : memref<256x128xbf16, #tpu.memory_space<vmem>>, vector<256x128xbf16>
    %cst = arith.constant dense<0.000000e+00> : vector<32x128xf32>
    %2 = tpu.matmul %0, %1, %cst {dimension_numbers = #tpu.dot_dimension_numbers<[1], [0], [0], [1], [0, 0, 1, 1], [], []>} : vector<32x256xbf16>, vector<256x128xbf16>, vector<32x128xf32> -> vector<32x128xf32>
    %c0_3 = arith.constant 0 : index
    %c0_4 = arith.constant 0 : index
    %3 = vector.load %arg3[%c0_3, %c0_4] : memref<1x128xf32, #tpu.memory_space<vmem>>, vector<1x128xf32>
    %4 = vector.broadcast %3 : vector<1x128xf32> to vector<32x128xf32>
    %5 = arith.mulf %2, %4 : vector<32x128xf32>
    %c0_5 = arith.constant 0 : index
    %c0_6 = arith.constant 0 : index
    %6 = vector.load %arg4[%c0_5, %c0_6] : memref<1x128xf32, #tpu.memory_space<vmem>>, vector<1x128xf32>
    %7 = vector.broadcast %6 : vector<1x128xf32> to vector<32x128xf32>
    %8 = arith.addf %5, %7 : vector<32x128xf32>
    %cst_7 = arith.constant 0.000000e+00 : f32
    %9 = vector.broadcast %cst_7 : f32 to vector<32x128xf32>
    %10 = arith.maximumf %8, %9 : vector<32x128xf32>
    %c0_8 = arith.constant 0 : index
    %c0_9 = arith.constant 0 : index
    %11 = vector.load %arg5[%c0_8, %c0_9] : memref<32x128xf32, #tpu.memory_space<vmem>>, vector<32x128xf32>
    tpu.vector_store %arg5[%c0_8, %c0_9], %10 {strides = array<i32>} : memref<32x128xf32, #tpu.memory_space<vmem>>, vector<32x128xf32>,
    return
  }
  func.func @transform_0(%arg0: i32) -> (i32, i32) {
    %c0_i32 = arith.constant 0 : i32
    %c0_i32_0 = arith.constant 0 : i32
    %c0_i32_1 = arith.constant 0 : i32
    return %c0_i32, %c0_i32_0 : i32, i32
  }
  func.func @transform_1(%arg0: i32) -> (i32, i32) {
    %c0_i32 = arith.constant 0 : i32
    %c0_i32_0 = arith.constant 0 : i32
    %c0_i32_1 = arith.constant 0 : i32
    return %c0_i32, %c0_i32_0 : i32, i32
  }
  func.func @transform_2(%arg0: i32) -> (i32, i32) {
    %c0_i32 = arith.constant 0 : i32
    %c0_i32_0 = arith.constant 0 : i32
    %c0_i32_1 = arith.constant 0 : i32
    return %c0_i32, %c0_i32_0 : i32, i32
  }
  func.func @transform_3(%arg0: i32) -> (i32, i32) {
    %c0_i32 = arith.constant 0 : i32
    %c0_i32_0 = arith.constant 0 : i32
    %c0_i32_1 = arith.constant 0 : i32
    return %c0_i32, %c0_i32_0 : i32, i32
  }
  func.func @transform_4(%arg0: i32) -> (i32, i32) {
    %c0_i32 = arith.constant 0 : i32
    %c0_i32_0 = arith.constant 0 : i32
    %c0_i32_1 = arith.constant 0 : i32
    return %c0_i32, %c0_i32_0 : i32, i32
  }
}

</mosaic_0001>

<bundles_post_ra>
// kernel: forward.1
= control target key start
LH: loop header
LB: loop body
LE: loop exit
PB: predicated region body
PF: predicated region fallthrough
CT: control target
= control target key end

     0   :  { %s444_s1 = inlined_call_operand.vmem [shape: bf16[256,128], index: 1, kind: input, shape index: {}]   ;;  %s445_s0 = inlined_call_operand.vmem [shape: bf16[32,256], index: 0, kind: input, shape index: {}]   ;;  %s446_s2 = inlined_call_operand.vmem [shape: f32[1,128], index: 2, kind: input, shape index: {}]   ;;  %s447_s3 = inlined_call_operand.vmem [shape: f32[1,128], index: 3, kind: input, shape index: {}]   ;;  %s448_s4 = inlined_call_operand.vmem [shape: f32[32,128], index: 4, kind: output, shape index: {}]  }
   0x1   :  { %v319_v0 = vld [vmem:[%s444_s1 + $0x40] sm:$0xff]   ;;  %v321_v2 = vld [vmem:[%s444_s1 + $0x48] sm:$0xff]   ;;  %v323_v4 = vld [vmem:[%s444_s1 + $0x50] sm:$0xff]  }
   0x2   :  { %v320_v1 = vld [vmem:[%s444_s1] sm:$0xff]   ;;  %275 = vmatprep.subr.bf16.mxu0 %v319_v0  ;;  %303 = vmatprep.subr.bf16.mxu1 %v319_v0  ;;  %v322_v3 = vld [vmem:[%s444_s1 + $0x8] sm:$0xff]   ;;  %v324_v5 = vld [vmem:[%s444_s1 + $0x10] sm:$0xff]  }
   0x3   :  { %276 = vmatpush3.bf16.msra.mxu0 %v320_v1  ;;  %311 = vmatpush3.bf16.msra.mxu1 %v320_v1  ;;  %v325_v6 = vld [vmem:[%s444_s1 + $0x58] sm:$0xff]   ;;  %v327_v8 = vld [vmem:[%s444_s1 + $0x60] sm:$0xff]   ;;  %v329_v10 = vld [vmem:[%s444_s1 + $0x68] sm:$0xff]  }
   0x4   :  { %277 = vmatprep.subr.bf16.mxu0 %v321_v2  ;;  %304 = vmatprep.subr.bf16.mxu1 %v321_v2  ;;  %v326_v7 = vld [vmem:[%s444_s1 + $0x18] sm:$0xff]   ;;  %v328_v9 = vld [vmem:[%s444_s1 + $0x20] sm:$0xff]   ;;  %v330_v13 = vld [vmem:[%s444_s1 + $0x28] sm:$0xff]  }
   0x5   :  { %v337_v11 = vld [vmem:[%s445_s0 + $0x4] ss:$8 sps:$4 sm:$0xff]   ;;  %v340_v12 = vld [vmem:[%s445_s0 + $0x14] ss:$8 sps:$4 sm:$0xff]   ;;  %v335_v18 = vld [vmem:[%s445_s0] ss:$8 sps:$4 sm:$0xff]  }
   0x6   :  { %v331_v14 = vld [vmem:[%s444_s1 + $0x70] sm:$0xff]   ;;  %202 = vmatprep.mubr.bf16.mxu0 %v337_v11  ;;  %210 = vmatprep.mubr.bf16.mxu1 %v340_v12  ;;  %v333_v16 = vld [vmem:[%s444_s1 + $0x78] sm:$0xff]   ;;  %v273_v23 = vld [vmem:[%s446_s2] ss:$0 sm:$0xff] }
   0x7   :  { %278 = vmatpush3.bf16.msra.mxu0 %v322_v3  ;;  %312 = vmatpush3.bf16.msra.mxu1 %v322_v3  ;;  %v332_v15 = vld [vmem:[%s444_s1 + $0x30] sm:$0xff]   ;;  %v334_v17 = vld [vmem:[%s444_s1 + $0x38] sm:$0xff]   ;;  %v274_v29 = vld [vmem:[%s447_s3] ss:$0 sm:$0xff] }
   0x8   :  { %279 = vmatprep.subr.bf16.mxu0 %v323_v4  ;;  %305 = vmatprep.subr.bf16.mxu1 %v323_v4  ;;  %v338_v19 = vld [vmem:[%s445_s0 + $0x10] ss:$8 sps:$4 sm:$0xff]  }
   0xb   :  { %280 = vmatpush3.bf16.msra.mxu0 %v324_v5  ;;  %313 = vmatpush3.bf16.msra.mxu1 %v324_v5 }
   0xc   :  { %281 = vmatprep.subr.bf16.mxu0 %v325_v6  ;;  %306 = vmatprep.subr.bf16.mxu1 %v325_v6 }
   0xf   :  { %282 = vmatpush3.bf16.msra.mxu0 %v326_v7  ;;  %314 = vmatpush3.bf16.msra.mxu1 %v326_v7 }
  0x10   :  { %283 = vmatprep.subr.bf16.mxu0 %v327_v8  ;;  %307 = vmatprep.subr.bf16.mxu1 %v327_v8 }
  0x13   :  { %284 = vmatpush3.bf16.msra.mxu0 %v328_v9  ;;  %315 = vmatpush3.bf16.msra.mxu1 %v328_v9 }
  0x14   :  { %285 = vmatprep.subr.bf16.mxu0 %v329_v10  ;;  %308 = vmatprep.subr.bf16.mxu1 %v329_v10 }
  0x17   :  { %286 = vmatpush3.bf16.msra.mxu0 %v330_v13  ;;  %316 = vmatpush3.bf16.msra.mxu1 %v330_v13 }
  0x18   :  { %287 = vmatprep.subr.bf16.mxu0 %v331_v14  ;;  %309 = vmatprep.subr.bf16.mxu1 %v331_v14 }
  0x1b   :  { %288 = vmatpush3.bf16.msra.mxu0 %v332_v15  ;;  %317 = vmatpush3.bf16.msra.mxu1 %v332_v15 }
  0x1c   :  { %289 = vmatprep.subr.bf16.mxu0 %v333_v16  ;;  %310 = vmatprep.subr.bf16.mxu1 %v333_v16 }
  0x1f   :  { %290 = vmatpush3.bf16.msra.mxu0 %v334_v17  ;;  %318 = vmatpush3.bf16.msra.mxu1 %v334_v17 }
  0x22   :  { %203 = vmatmul.mubr.bf16.vlgmr.msra.gmra.mrb[0].mxu0 %v335_v18  ;;  %211 = vmatmul.mubr.bf16.vlgmr.msra.gmra.mrb[0].mxu1 %v338_v19 }
  0xf5   :  { %v291_v20 = vpop.f32.mrb[0].mxu0  ;;  %v297_v21 = vpop.f32.mrb[0].mxu1 }
  0xf6   :  { %v292_v22 = vpop.f32.mrb[1].mxu0  ;;  %v298_v24 = vpop.f32.mrb[1].mxu1 }
  0xf7   :  { %v293_v25 = vadd.f32 %v292_v22, %v291_v20  ;;  %v299_v26 = vadd.f32 %v298_v24, %v297_v21  ;;  %v294_v27 = vpop.f32.mrb[2].mxu0  ;;  %v300_v28 = vpop.f32.mrb[2].mxu1 }
  0xf8   :  { %v295_v30 = vpop.f32.mrb[3].mxu0  ;;  %v301_v31 = vpop.f32.mrb[3].mxu1 }
  0xf9   :  { %v226_v32 = vmul.f32 %v293_v25, %v273_v23  ;;  %v228_v33 = vmul.f32 %v299_v26, %v273_v23  ;;  %v296_v34 = vadd.f32 %v295_v30, %v294_v27  ;;  %v302_v35 = vadd.f32 %v301_v31, %v300_v28 }
  0xfb   :  { %v237_v36 = vadd.f32 %v274_v29, %v226_v32  ;;  %v239_v37 = vadd.f32 %v274_v29, %v228_v33  ;;  %v227_v38 = vmul.f32 %v296_v34, %v273_v23  ;;  %v229_v39 = vmul.f32 %v302_v35, %v273_v23 }
  0xfd   :  { %v241_v40 = vmax.f32 %v237_v36, 0.0  ;;  %v243_v41 = vmax.f32 %v239_v37, 0.0  ;;  %v238_v42 = vadd.f32 %v274_v29, %v227_v38  ;;  %v240_v43 = vadd.f32 %v274_v29, %v229_v39 }
  0xff   :  { %245 = vst [vmem:[%s448_s4] sm:$0xff] %v241_v40  ;;  %247 = vst [vmem:[%s448_s4 + $0x10] sm:$0xff] %v243_v41  ;;  %v242_v44 = vmax.f32 %v238_v42, 0.0  ;;  %v244_v45 = vmax.f32 %v240_v43, 0.0 }
 0x101   :  { %246 = vst [vmem:[%s448_s4 + $0x8] sm:$0xff] %v242_v44  ;;  %248 = vst [vmem:[%s448_s4 + $0x18] sm:$0xff] %v244_v45 }

</bundles_post_ra>
